<compile_context>
chip_gen: v6e
topology: v6e:2x2x1
jax: 0.10.0
libtpu: 0.0.40
codegen_flags: <defaults>
</compile_context>

<pallas_src>
import functools

import jax
import jax.numpy as jnp
from jax.experimental import pallas as pl
from jax.experimental.pallas import tpu as pltpu


# ----------------------------------------------------------------------------
# Kernels
# ----------------------------------------------------------------------------

def _focus_fused_kernel(x_ref, wT_ref, b_ref, o_ref, *, W, W2, th):
    """Fused space-to-depth + 1x1 conv (BN folded) + SiLU.

    x_ref : (C1, th, 2*W)   `th` output-row pairs; lane axis is
                            [even input row | odd input row] concatenated.
    wT_ref: (C2, 4*C1)      BN-scale-folded weight (VMEM resident).
    b_ref : (C2, 1)         folded BN bias (VMEM resident).
    o_ref : (C2, th*W2)     lane-dense flattened output rows.
    """
    # Space-to-depth: four strided lane slices, same order as the torch.cat:
    # (even row, even col), (odd row, even col), (even row, odd col), (odd, odd)
    groups = [
        x_ref[:, :, pl.ds(r * W + p, W2, stride=2)]          # (C1, th, W2)
        for (r, p) in ((0, 0), (1, 0), (0, 1), (1, 1))
    ]
    xg = jnp.concatenate(groups, axis=0)                      # (4*C1, th, W2)

    # Flatten the row dim into lanes -> (4*C1, th*W2) so a single MXU dot
    # covers the whole tile.  Spelled as static slices + lane concatenation.
    if th > 1:
        rhs = jnp.concatenate([xg[:, q, :] for q in range(th)], axis=-1)
    else:
        rhs = xg[:, 0, :]

    y = jnp.dot(wT_ref[...], rhs, preferred_element_type=jnp.float32)
    y = y + b_ref[...]
    # TODO(synk): optional bf16 streaming + pl.reciprocal(approx=True) SiLU
    # (review items) left out to keep exact f32 parity with the reference.
    o_ref[...] = (y * jax.nn.sigmoid(y)).astype(o_ref.dtype)


def _focus_matmul_kernel(x_ref, wT_ref, b_ref, o_ref):
    """Fallback kernel: 1x1 conv + folded-BN bias + SiLU on pre-concatenated
    space-to-depth patches.  x_ref: (K, tm), o_ref: (C2, tm)."""
    y = jnp.dot(wT_ref[...], x_ref[...], preferred_element_type=jnp.float32)
    y = y + b_ref[...]
    o_ref[...] = (y * jax.nn.sigmoid(y)).astype(o_ref.dtype)


# ----------------------------------------------------------------------------
# Wrapper helpers
# ----------------------------------------------------------------------------

def _fold_bn(w, gamma, beta, mean, var, eps):
    scale = gamma / jnp.sqrt(var + eps)                # (C2,)
    wT = (w * scale[None, :]).T                        # (C2, K) scale folded in
    bias = (beta - mean * scale).reshape(-1, 1)        # (C2, 1)
    return wT, bias


def _fused_vmem_bytes(th, C1, C2, W, W2, itemsize=4):
    """Rough VMEM footprint of one fused grid step (double-buffered I/O +
    in-kernel temporaries), used for tile selection and vmem_limit_bytes."""
    K = 4 * C1
    in_blk = C1 * th * 2 * W * itemsize
    out_blk = C2 * th * W2 * itemsize
    temps = (2 * K + 2 * C2) * th * W2 * itemsize
    return 2 * in_blk + 2 * out_blk + temps


def _pick_row_block(H2, W2, C1, C2, W, budget_bytes):
    """Largest row-block th that (a) divides H2 (no pad/slice), (b) meets the
    TPU (8,128) block constraints, (c) fits the VMEM budget; prefers >=2
    blocks per image so megacore can split work even at batch 1."""
    cands = []
    for d in range(1, H2 + 1):
        if H2 % d:
            continue
        aligned = (d == H2) or (d % 8 == 0 and (d * W2) % 128 == 0)
        if aligned and _fused_vmem_bytes(d, C1, C2, W, W2) <= budget_bytes:
            cands.append(d)
    if not cands:
        return None
    multi = [d for d in cands if H2 // d >= 2]
    return max(multi) if multi else max(cands)


# ----------------------------------------------------------------------------
# Forward pass
# ----------------------------------------------------------------------------

def _focus_fused(x, wT, bias, th, vmem_budget_bytes):
    N, C1, H, W = x.shape
    C2 = wT.shape[0]
    H2, W2 = H // 2, W // 2
    M = H2 * W2
    n_blk = H2 // th

    x4 = x.reshape(N, C1, H2, 2 * W)                   # free view (row pairs)

    est = _fused_vmem_bytes(th, C1, C2, W, W2)
    vmem_limit = max(16 * 1024 * 1024,
                     min(48 * 1024 * 1024, int(1.5 * est) + (1 << 20)))

    kern = functools.partial(_focus_fused_kernel, W=W, W2=W2, th=th)
    out = pl.pallas_call(
        kern,
        out_shape=jax.ShapeDtypeStruct((N, C2, M), x.dtype),
        grid_spec=pltpu.PrefetchScalarGridSpec(
            num_scalar_prefetch=0,
            grid=(N, n_blk),
            in_specs=[
                pl.BlockSpec((None, C1, th, 2 * W), lambda n, m: (n, 0, m, 0)),
                pl.BlockSpec((C2, 4 * C1), lambda n, m: (0, 0)),   # resident
                pl.BlockSpec((C2, 1), lambda n, m: (0, 0)),        # resident
            ],
            out_specs=pl.BlockSpec((None, C2, th * W2), lambda n, m: (n, 0, m)),
        ),
        compiler_params=pltpu.CompilerParams(
            dimension_semantics=("parallel", "parallel"),
            vmem_limit_bytes=vmem_limit,
        ),
    )(x4, wT, bias)
    return out.reshape(N, C2, H2, W2)                  # free reshape (NCHW)


def _focus_unfused(x, wT, bias, tm=16384):
    """Proven fallback: space-to-depth in the wrapper (one extra HBM pass),
    then a lane-tiled channel-major 1x1-conv kernel."""
    N, C1, H, W = x.shape
    C2 = wT.shape[0]
    K = 4 * C1
    H2, W2 = H // 2, W // 2
    M = H2 * W2

    patches = jnp.concatenate(
        [x[..., ::2, ::2], x[..., 1::2, ::2], x[..., ::2, 1::2], x[..., 1::2, 1::2]],
        axis=1,
    ).reshape(N, K, M)

    if N == 1 and M >= 256:
        # keep at least two lane blocks so both v7x cores get work at batch 1
        tm = min(tm, ((M + 1) // 2 + 127) // 128 * 128)

    if M <= tm:
        tm_eff, m_pad = M, M
    else:
        tm_eff = max(128, (tm // 128) * 128)
        m_pad = pl.cdiv(M, tm_eff) * tm_eff
        if m_pad != M:
            patches = jnp.pad(patches, ((0, 0), (0, 0), (0, m_pad - M)))

    out = pl.pallas_call(
        _focus_matmul_kernel,
        out_shape=jax.ShapeDtypeStruct((N, C2, m_pad), x.dtype),
        grid_spec=pltpu.PrefetchScalarGridSpec(
            num_scalar_prefetch=0,
            grid=(N, m_pad // tm_eff),
            in_specs=[
                pl.BlockSpec((None, K, tm_eff), lambda n, m: (n, 0, m)),
                pl.BlockSpec((C2, K), lambda n, m: (0, 0)),
                pl.BlockSpec((C2, 1), lambda n, m: (0, 0)),
            ],
            out_specs=pl.BlockSpec((None, C2, tm_eff), lambda n, m: (n, 0, m)),
        ),
        compiler_params=pltpu.CompilerParams(
            dimension_semantics=("parallel", "parallel"),
            vmem_limit_bytes=32 * 1024 * 1024,
        ),
    )(patches, wT, bias)

    if m_pad != M:
        out = out[:, :, :M]
    return out.reshape(N, C2, H2, W2)


def focus_forward(x, w, bn_gamma, bn_beta, bn_mean, bn_var, eps=1e-5,
                  vmem_budget_bytes=28 * 1024 * 1024):
    """Focus forward.  x: (N, C1, H, W) NCHW f32.  w: (4*C1, C2) 1x1-conv
    weight as an (in, out) matmul matrix.  Returns (N, C2, H//2, W//2)."""
    N, C1, H, W = x.shape
    K, C2 = w.shape
    assert K == 4 * C1 and H % 2 == 0 and W % 2 == 0

    wT, bias = _fold_bn(w, bn_gamma, bn_beta, bn_mean, bn_var, eps)

    th = _pick_row_block(H // 2, W // 2, C1, C2, W, vmem_budget_bytes)
    if th is not None:
        try:
            return _focus_fused(x, wT, bias, th, vmem_budget_bytes)
        except Exception:
            # Mosaic lowering of the fused kernel not supported on this
            # backend/version -> use the proven two-pass implementation.
            pass
    return _focus_unfused(x, wT, bias)


# ----------------------------------------------------------------------------
# Pure-JAX reference (matches the PyTorch module, inference mode)
# ----------------------------------------------------------------------------

def _focus_reference(x, w, bn_gamma, bn_beta, bn_mean, bn_var, eps=1e-5):
    patches = jnp.concatenate(
        [x[..., ::2, ::2], x[..., 1::2, ::2], x[..., ::2, 1::2], x[..., 1::2, 1::2]],
        axis=1,
    )
    conv = jnp.einsum("nkhw,kc->nchw", patches, w)
    scale = bn_gamma / jnp.sqrt(bn_var + eps)
    bias = bn_beta - bn_mean * scale
    y = conv * scale[None, :, None, None] + bias[None, :, None, None]
    return y * jax.nn.sigmoid(y)


if __name__ == "__main__":
    def make_inputs(key, N, C1, H, W, C2):
        K = 4 * C1
        kx, kw, kg, kb, km, kv = jax.random.split(key, 6)
        x = jax.random.normal(kx, (N, C1, H, W), dtype=jnp.float32)
        w = 0.1 * jax.random.normal(kw, (K, C2), dtype=jnp.float32)
        g = 1.0 + 0.1 * jax.random.normal(kg, (C2,), dtype=jnp.float32)
        b = 0.1 * jax.random.normal(kb, (C2,), dtype=jnp.float32)
        m = 0.05 * jax.random.normal(km, (C2,), dtype=jnp.float32)
        v = jnp.abs(1.0 + 0.1 * jax.random.normal(kv, (C2,), dtype=jnp.float32))
        return x, w, g, b, m, v

    # 1) Small case: whole image in a single block.
    a1 = make_inputs(jax.random.PRNGKey(0), 2, 4, 16, 16, 32)
    o1 = jax.block_until_ready(focus_forward(*a1))
    r1 = _focus_reference(*a1)
    assert o1.shape == (2, 32, 8, 8)
    assert jnp.allclose(o1, r1, atol=1e-4, rtol=1e-4)

    # 2) Non-128-friendly spatial size (20x20 output) -> th == H2, no padding.
    a2 = make_inputs(jax.random.PRNGKey(1), 2, 3, 40, 40, 16)
    o2 = jax.block_until_ready(focus_forward(*a2))
    r2 = _focus_reference(*a2)
    assert o2.shape == (2, 16, 20, 20)
    assert jnp.allclose(o2, r2, atol=1e-4, rtol=1e-4)

    # 3) Multi-row-block grid (megacore-friendly tiling) at batch 1.
    a3 = make_inputs(jax.random.PRNGKey(2), 1, 3, 32, 32, 16)
    o3 = jax.block_until_ready(focus_forward(*a3))
    r3 = _focus_reference(*a3)
    assert o3.shape == (1, 16, 16, 16)
    assert jnp.allclose(o3, r3, atol=1e-4, rtol=1e-4)

    print("KERNEL_OK")
</pallas_src>

<mosaic_0001>
module attributes {stable_mosaic.version = 11 : i64} {
  func.func @_focus_fused_kernel(%arg0: i32, %arg1: i32, %arg2: memref<1x4x8x32xf32, #tpu.memory_space<vmem>>, %arg3: memref<32x16xf32, #tpu.memory_space<vmem>>, %arg4: memref<32x1xf32, #tpu.memory_space<vmem>>, %arg5: memref<1x32x64xf32, #tpu.memory_space<vmem>>) attributes {dimension_semantics = [#tpu.dimension_semantics<parallel>, #tpu.dimension_semantics<parallel>], iteration_bounds = array<i64: 2, 1>, scalar_prefetch = 0 : i64, scratch_operands = 0 : i64, tpu.core_type = #tpu.core_type<tc>, window_params = [{transform_indices = @transform_0, window_bounds = array<i64: 1, 4, 8, 32>}, {pipeline_mode = #tpu.pipeline_mode<synchronous>, transform_indices = @transform_1, window_bounds = array<i64: 32, 16>}, {pipeline_mode = #tpu.pipeline_mode<synchronous>, transform_indices = @transform_2, window_bounds = array<i64: 32, 1>}, {transform_indices = @transform_3, window_bounds = array<i64: 1, 32, 64>}]} {
    %c0 = arith.constant 0 : index
    %c0_0 = arith.constant 0 : index
    %c0_1 = arith.constant 0 : index
    %c0_2 = arith.constant 0 : index
    %0 = tpu.strided_load %arg2[%c0, %c0_0, %c0_1, %c0_2] {strides = array<i32: 1, 1, 1, 2>} : memref<1x4x8x32xf32, #tpu.memory_space<vmem>>, vector<1x4x8x8xf32>
    %1 = vector.shape_cast %0 : vector<1x4x8x8xf32> to vector<4x8x8xf32>
    %c0_3 = arith.constant 0 : index
    %c0_4 = arith.constant 0 : index
    %c0_5 = arith.constant 0 : index
    %c16 = arith.constant 16 : index
    %2 = tpu.strided_load %arg2[%c0_3, %c0_4, %c0_5, %c16] {strides = array<i32: 1, 1, 1, 2>} : memref<1x4x8x32xf32, #tpu.memory_space<vmem>>, vector<1x4x8x8xf32>
    %3 = vector.shape_cast %2 : vector<1x4x8x8xf32> to vector<4x8x8xf32>
    %c0_6 = arith.constant 0 : index
    %c0_7 = arith.constant 0 : index
    %c0_8 = arith.constant 0 : index
    %c1 = arith.constant 1 : index
    %4 = tpu.strided_load %arg2[%c0_6, %c0_7, %c0_8, %c1] {strides = array<i32: 1, 1, 1, 2>} : memref<1x4x8x32xf32, #tpu.memory_space<vmem>>, vector<1x4x8x8xf32>
    %5 = vector.shape_cast %4 : vector<1x4x8x8xf32> to vector<4x8x8xf32>
    %c0_9 = arith.constant 0 : index
    %c0_10 = arith.constant 0 : index
    %c0_11 = arith.constant 0 : index
    %c17 = arith.constant 17 : index
    %6 = tpu.strided_load %arg2[%c0_9, %c0_10, %c0_11, %c17] {strides = array<i32: 1, 1, 1, 2>} : memref<1x4x8x32xf32, #tpu.memory_space<vmem>>, vector<1x4x8x8xf32>
    %7 = vector.shape_cast %6 : vector<1x4x8x8xf32> to vector<4x8x8xf32>
    %8 = tpu.concatenate %1, %3, %5, %7 in 0 : vector<4x8x8xf32>, vector<4x8x8xf32>, vector<4x8x8xf32>, vector<4x8x8xf32> -> vector<16x8x8xf32>
    %9 = vector.extract_strided_slice %8 {offsets = [0, 0, 0], sizes = [16, 1, 8], strides = [1, 1, 1]} : vector<16x8x8xf32> to vector<16x1x8xf32>
    %10 = vector.shape_cast %9 : vector<16x1x8xf32> to vector<16x8xf32>
    %11 = vector.extract_strided_slice %8 {offsets = [0, 1, 0], sizes = [16, 1, 8], strides = [1, 1, 1]} : vector<16x8x8xf32> to vector<16x1x8xf32>
    %12 = vector.shape_cast %11 : vector<16x1x8xf32> to vector<16x8xf32>
    %13 = vector.extract_strided_slice %8 {offsets = [0, 2, 0], sizes = [16, 1, 8], strides = [1, 1, 1]} : vector<16x8x8xf32> to vector<16x1x8xf32>
    %14 = vector.shape_cast %13 : vector<16x1x8xf32> to vector<16x8xf32>
    %15 = vector.extract_strided_slice %8 {offsets = [0, 3, 0], sizes = [16, 1, 8], strides = [1, 1, 1]} : vector<16x8x8xf32> to vector<16x1x8xf32>
    %16 = vector.shape_cast %15 : vector<16x1x8xf32> to vector<16x8xf32>
    %17 = vector.extract_strided_slice %8 {offsets = [0, 4, 0], sizes = [16, 1, 8], strides = [1, 1, 1]} : vector<16x8x8xf32> to vector<16x1x8xf32>
    %18 = vector.shape_cast %17 : vector<16x1x8xf32> to vector<16x8xf32>
    %19 = vector.extract_strided_slice %8 {offsets = [0, 5, 0], sizes = [16, 1, 8], strides = [1, 1, 1]} : vector<16x8x8xf32> to vector<16x1x8xf32>
    %20 = vector.shape_cast %19 : vector<16x1x8xf32> to vector<16x8xf32>
    %21 = vector.extract_strided_slice %8 {offsets = [0, 6, 0], sizes = [16, 1, 8], strides = [1, 1, 1]} : vector<16x8x8xf32> to vector<16x1x8xf32>
    %22 = vector.shape_cast %21 : vector<16x1x8xf32> to vector<16x8xf32>
    %23 = vector.extract_strided_slice %8 {offsets = [0, 7, 0], sizes = [16, 1, 8], strides = [1, 1, 1]} : vector<16x8x8xf32> to vector<16x1x8xf32>
    %24 = vector.shape_cast %23 : vector<16x1x8xf32> to vector<16x8xf32>
    %25 = tpu.concatenate %10, %12, %14, %16, %18, %20, %22, %24 in 1 : vector<16x8xf32>, vector<16x8xf32>, vector<16x8xf32>, vector<16x8xf32>, vector<16x8xf32>, vector<16x8xf32>, vector<16x8xf32>, vector<16x8xf32> -> vector<16x64xf32>
    %c0_12 = arith.constant 0 : index
    %c0_13 = arith.constant 0 : index
    %26 = vector.load %arg3[%c0_12, %c0_13] : memref<32x16xf32, #tpu.memory_space<vmem>>, vector<32x16xf32>
    %cst = arith.constant dense<0.000000e+00> : vector<32x64xf32>
    %27 = tpu.matmul %26, %25, %cst {dimension_numbers = #tpu.dot_dimension_numbers<[1], [0], [0], [1], [0, 0, 1, 1], [], []>} : vector<32x16xf32>, vector<16x64xf32>, vector<32x64xf32> -> vector<32x64xf32>
    %c0_14 = arith.constant 0 : index
    %c0_15 = arith.constant 0 : index
    %28 = vector.load %arg4[%c0_14, %c0_15] : memref<32x1xf32, #tpu.memory_space<vmem>>, vector<32x1xf32>
    %29 = vector.broadcast %28 : vector<32x1xf32> to vector<32x64xf32>
    %30 = arith.addf %27, %29 : vector<32x64xf32>
    %31 = arith.negf %30 : vector<32x64xf32>
    %32 = math.exp %31 : vector<32x64xf32>
    %cst_16 = arith.constant 1.000000e+00 : f32
    %33 = vector.broadcast %cst_16 : f32 to vector<32x64xf32>
    %34 = arith.addf %33, %32 : vector<32x64xf32>
    %35 = arith.divf %33, %34 : vector<32x64xf32>
    %36 = arith.mulf %30, %35 : vector<32x64xf32>
    %c0_17 = arith.constant 0 : index
    %c0_18 = arith.constant 0 : index
    %c0_19 = arith.constant 0 : index
    %37 = vector.load %arg5[%c0_17, %c0_18, %c0_19] : memref<1x32x64xf32, #tpu.memory_space<vmem>>, vector<1x32x64xf32>
    %38 = vector.shape_cast %37 : vector<1x32x64xf32> to vector<32x64xf32>
    %39 = vector.shape_cast %36 : vector<32x64xf32> to vector<1x32x64xf32>
    tpu.vector_store %arg5[%c0_17, %c0_18, %c0_19], %39 {strides = array<i32>} : memref<1x32x64xf32, #tpu.memory_space<vmem>>, vector<1x32x64xf32>,
    return
  }
  func.func @transform_0(%arg0: i32, %arg1: i32) -> (i32, i32, i32, i32) {
    %c0_i32 = arith.constant 0 : i32
    %c0_i32_0 = arith.constant 0 : i32
    %c0_i32_1 = arith.constant 0 : i32
    return %arg0, %c0_i32, %arg1, %c0_i32_0 : i32, i32, i32, i32
  }
  func.func @transform_1(%arg0: i32, %arg1: i32) -> (i32, i32) {
    %c0_i32 = arith.constant 0 : i32
    %c0_i32_0 = arith.constant 0 : i32
    %c0_i32_1 = arith.constant 0 : i32
    return %c0_i32, %c0_i32_0 : i32, i32
  }
  func.func @transform_2(%arg0: i32, %arg1: i32) -> (i32, i32) {
    %c0_i32 = arith.constant 0 : i32
    %c0_i32_0 = arith.constant 0 : i32
    %c0_i32_1 = arith.constant 0 : i32
    return %c0_i32, %c0_i32_0 : i32, i32
  }
  func.func @transform_3(%arg0: i32, %arg1: i32) -> (i32, i32, i32) {
    %c0_i32 = arith.constant 0 : i32
    %c0_i32_0 = arith.constant 0 : i32
    return %arg0, %c0_i32, %arg1 : i32, i32, i32
  }
}

module attributes {stable_mosaic.version = 11 : i64} {
  func.func @_focus_matmul_kernel(%arg0: i32, %arg1: i32, %arg2: memref<1x16x64xf32, #tpu.memory_space<vmem>>, %arg3: memref<32x16xf32, #tpu.memory_space<vmem>>, %arg4: memref<32x1xf32, #tpu.memory_space<vmem>>, %arg5: memref<1x32x64xf32, #tpu.memory_space<vmem>>) attributes {dimension_semantics = [#tpu.dimension_semantics<parallel>, #tpu.dimension_semantics<parallel>], iteration_bounds = array<i64: 2, 1>, scalar_prefetch = 0 : i64, scratch_operands = 0 : i64, tpu.core_type = #tpu.core_type<tc>, window_params = [{transform_indices = @transform_0, window_bounds = array<i64: 1, 16, 64>}, {pipeline_mode = #tpu.pipeline_mode<synchronous>, transform_indices = @transform_1, window_bounds = array<i64: 32, 16>}, {pipeline_mode = #tpu.pipeline_mode<synchronous>, transform_indices = @transform_2, window_bounds = array<i64: 32, 1>}, {transform_indices = @transform_3, window_bounds = array<i64: 1, 32, 64>}]} {
    %c0 = arith.constant 0 : index
    %c0_0 = arith.constant 0 : index
    %0 = vector.load %arg3[%c0, %c0_0] : memref<32x16xf32, #tpu.memory_space<vmem>>, vector<32x16xf32>
    %c0_1 = arith.constant 0 : index
    %c0_2 = arith.constant 0 : index
    %c0_3 = arith.constant 0 : index
    %1 = vector.load %arg2[%c0_1, %c0_2, %c0_3] : memref<1x16x64xf32, #tpu.memory_space<vmem>>, vector<1x16x64xf32>
    %2 = vector.shape_cast %1 : vector<1x16x64xf32> to vector<16x64xf32>
    %cst = arith.constant dense<0.000000e+00> : vector<32x64xf32>
    %3 = tpu.matmul %0, %2, %cst {dimension_numbers = #tpu.dot_dimension_numbers<[1], [0], [0], [1], [0, 0, 1, 1], [], []>} : vector<32x16xf32>, vector<16x64xf32>, vector<32x64xf32> -> vector<32x64xf32>
    %c0_4 = arith.constant 0 : index
    %c0_5 = arith.constant 0 : index
    %4 = vector.load %arg4[%c0_4, %c0_5] : memref<32x1xf32, #tpu.memory_space<vmem>>, vector<32x1xf32>
    %5 = vector.broadcast %4 : vector<32x1xf32> to vector<32x64xf32>
    %6 = arith.addf %3, %5 : vector<32x64xf32>
    %7 = arith.negf %6 : vector<32x64xf32>
    %8 = math.exp %7 : vector<32x64xf32>
    %cst_6 = arith.constant 1.000000e+00 : f32
    %9 = vector.broadcast %cst_6 : f32 to vector<32x64xf32>
    %10 = arith.addf %9, %8 : vector<32x64xf32>
    %11 = arith.divf %9, %10 : vector<32x64xf32>
    %12 = arith.mulf %6, %11 : vector<32x64xf32>
    %c0_7 = arith.constant 0 : index
    %c0_8 = arith.constant 0 : index
    %c0_9 = arith.constant 0 : index
    %13 = vector.load %arg5[%c0_7, %c0_8, %c0_9] : memref<1x32x64xf32, #tpu.memory_space<vmem>>, vector<1x32x64xf32>
    %14 = vector.shape_cast %13 : vector<1x32x64xf32> to vector<32x64xf32>
    %15 = vector.shape_cast %12 : vector<32x64xf32> to vector<1x32x64xf32>
    tpu.vector_store %arg5[%c0_7, %c0_8, %c0_9], %15 {strides = array<i32>} : memref<1x32x64xf32, #tpu.memory_space<vmem>>, vector<1x32x64xf32>,
    return
  }
  func.func @transform_0(%arg0: i32, %arg1: i32) -> (i32, i32, i32) {
    %c0_i32 = arith.constant 0 : i32
    %c0_i32_0 = arith.constant 0 : i32
    return %arg0, %c0_i32, %arg1 : i32, i32, i32
  }
  func.func @transform_1(%arg0: i32, %arg1: i32) -> (i32, i32) {
    %c0_i32 = arith.constant 0 : i32
    %c0_i32_0 = arith.constant 0 : i32
    %c0_i32_1 = arith.constant 0 : i32
    return %c0_i32, %c0_i32_0 : i32, i32
  }
  func.func @transform_2(%arg0: i32, %arg1: i32) -> (i32, i32) {
    %c0_i32 = arith.constant 0 : i32
    %c0_i32_0 = arith.constant 0 : i32
    %c0_i32_1 = arith.constant 0 : i32
    return %c0_i32, %c0_i32_0 : i32, i32
  }
  func.func @transform_3(%arg0: i32, %arg1: i32) -> (i32, i32, i32) {
    %c0_i32 = arith.constant 0 : i32
    %c0_i32_0 = arith.constant 0 : i32
    return %arg0, %c0_i32, %arg1 : i32, i32, i32
  }
}

</mosaic_0001>

<bundles_post_ra>
// kernel: tpu_custom_call.1
= control target key start
LH: loop header
LB: loop body
LE: loop exit
PB: predicated region body
PF: predicated region fallthrough
CT: control target
= control target key end

     0   :  { %8 = vsyncpa [#allocation3], 0  ;;  %s815_s0 = inlined_call_operand.vmem [shape: f32[2,16,64], index: 0, kind: input, shape index: {}]   ;;  %s816_s1 = inlined_call_operand.vmem [shape: f32[32,16], index: 1, kind: input, shape index: {}]   ;;  %s817_s2 = inlined_call_operand.vmem [shape: f32[32,1], index: 2, kind: input, shape index: {}]   ;;  %s818_s3 = inlined_call_operand.hbm [shape: f32[2,32,64], index: 3, kind: output, shape index: {}]  }
   0x1   :  { %10 = vsyncpa [#allocation3 + $0x1], 0  ;;  %s669_s12 = smov 0   ;;  %s671_s13 = smov 0  }
   0x2   :  { %s673_s14 = smov 0   ;;  %s675_s15 = smov 0  }
   0x3   :  { %s677_s16 = smov 0   ;;  %s679_s17 = smov 0  }
   0x4 LB: > { %s448_s18 = sadd.s32 4294967295, %s643_s17   ;;  %s449_s19 = sadd.s32 4294967294, %s643_s17   ;;  %s643_s17 = sphi %s679_s17, %s16_s17   ;;  %s639_s16 = sphi %s677_s16, %s825_s16   ;;  %s635_s15 = sphi %s675_s15, %s824_s15   ;;  %s631_s14 = sphi %s673_s14, %s823_s14   ;;  %s627_s13 = sphi %s671_s13, %s822_s13   ;;  %s623_s12 = sphi %s669_s12, %s821_s12  }
   0x5   : > { %s28_s20 = sadd.s32 1, %s639_s16  ;;  %s107_s21 = sadd.s32 1, %s631_s14 }
   0x6   : > { %p30_p0 = scmp.ge.s32.totalorder %s28_s20, 2  ;;  %p117_p1 = scmp.ne.s32.totalorder %s631_s14, %s627_s13 }
   0x7   : > { %p118_p2 = scmp.eq.s32.totalorder %s448_s18, 1  ;;  %p123_p3 = scmp.ne.s32.totalorder %s627_s13, %s623_s12 }
   0x8   : > { %s827_s20 = smov (%p30_p0, %s28_s20), 0  ;;  %p124_p5 = scmp.eq.s32.totalorder %s449_s19, 1 }
   0x9   : > { %p709_p4 = por %p118_p2, %p117_p1  ;;  %s102_s23 = ssub.s32 %s639_s16, %s827_s20 }
   0xa   : > { %p452_p6 = scmp.ge.s32.totalorder %s643_s17, 1  ;;  %p105_p7 = scmp.eq.s32.totalorder %s102_s23, 0 }
   0xb   : > { %p716_p8 = por %p124_p5, %p123_p3  ;;  %p159_p9 = scmp.lt.s32.totalorder %s643_s17, 3 }
   0xc   : > { %s722_s25 = scalar_select %p105_p7, %s631_s14, %s107_s21  }
   0xd   : > { %p160_p10 = pnand %p452_p6, %p159_p9 }
   0xe   : > { %p186_p11 = scmp.lt.s32.totalorder (!%p160_p10), %s635_s15, 1  ;;  %s183_s30 = sand.u32 (!%p160_p10), 1, %s627_s13  }
   0xf   : > { %163 = sbr.rel (%p160_p10) target bundleno = 275 (0x113), region = 32  ;;  %s453_s4 = sshll.u32 (!%p160_p10), %s183_s30, 5 }
  0x10   : > { %s185_s5 = scalar_lea.vmem (!%p160_p10), [#allocation2], %s453_s4  ;;  %s646_s18 = smov (!%p160_p10), [#allocation2]  }
  0x11   : > { %s370_s6 = sshll.u32 (!%p160_p10), %s185_s5, 4  ;;  %s571_s19 = sshll.u32 (!%p160_p10), %s646_s18, 4  ;;  %s765_s6 = int_to_ptr.vmem [resolvable:$true] %s370_s6  ;;  %s572_s19 = int_to_ptr.vmem [resolvable:$false] %s571_s19 }
  0x12   : > { %s573_s21 = scalar_lea.vmem (!%p160_p10), %s572_s19, 1024  ;;  %p574_p1 = scmp.lt.s32.totalorder (!%p160_p10), %s765_s6, %s572_s19 }
  0x14   : > { %v194_v0 = vld [vmem:[%s816_s1] sm:$0xff]  ;;  %vm224_vm0 = vcmask 130048   ;;  %v196_v1 = vld [vmem:[%s816_s1 + $0x10] sm:$0xff]  ;;  %s187_s7 = scalar_select %p186_p11, %s635_s15, 1  ;;  %v645_v4 = vmov 0   ;;  %v195_v7 = vld [vmem:[%s816_s1 + $0x8] sm:$0xff] }
  0x15   : > { %481 = vmatprep.mubr.msk.f32.mxu0 %vm224_vm0, %v194_v0  ;;  %484 = vmatprep.mubr.msk.f32.mxu1 %vm224_vm0, %v196_v1  ;;  %v202_v2 = vld [vmem:[%s817_s2 + $0x10] sm:$0xff]  ;;  %v200_v3 = vld [vmem:[%s817_s2] sm:$0xff]  ;;  %v197_v8 = vld [vmem:[%s816_s1 + $0x18] sm:$0xff]  ;;  %vm350_vm1 = vcmask 523264  }
  0x16   : > { %550 = vset.pattern.permute.xlu1 %v645_v4  ;;  %549 = vset.pattern.permute.xlu0 %v645_v4  ;;  %s469_s8 = sshll.u32 %s187_s7, 4  ;;  %v203_v9 = vld [vmem:[%s817_s2 + $0x18] sm:$0xff]  ;;  %v201_v10 = vld [vmem:[%s817_s2 + $0x8] sm:$0xff]  ;;  %s470_s7 = sshll.u32 %s635_s15, 9 }
  0x17   : > { %216 = vperm.xlu1 %550, %v202_v2   ;;  %206 = vperm.xlu0 %549, %v200_v3   ;;  %s193_s11 = scalar_lea.vmem %s815_s0, %s469_s8  ;;  %s763_s10 = scalar_lea.hbm %s818_s3, %s470_s7 }
  0x18   : > { %v199_v5 = vld [vmem:[%s193_s11 + $0x8] sm:$0xff]  ;;  %v198_v6 = vld [vmem:[%s193_s11] sm:$0xff]  ;;  %s770_s15 = scalar_lea.sflag [#allocation3], %s183_s30  ;;  %s567_s11 = scalar_lea.vmem %s765_s6, 512 }
  0x19   : > { %477 = vmatprep.subr.mxu0 %v199_v5  ;;  %487 = vmatprep.subr.mxu1 %v199_v5  ;;  %p568_p12 = scmp.ne.s32.totalorder %s765_s6, %s567_s11  ;;  %p575_p2 = scmp.lt.s32.totalorder %s573_s21, %s567_s11 }
  0x1a   : > { %478 = vmatpush3.msra.mxu0 %v199_v5  ;;  %489 = vmatpush3.msra.mxu1 %v199_v5 }
  0x1b   : > { %479 = vmatprep.subr.mxu0 %v198_v6  ;;  %488 = vmatprep.subr.mxu1 %v198_v6  ;;  %p569_p13 = pnand %p568_p12, %p709_p4  ;;  %p576_p3 = por %p575_p2, %p574_p1 }
  0x1c   : > { %480 = vmatpush3.msra.mxu0 %v198_v6  ;;  %490 = vmatpush3.msra.mxu1 %v198_v6 }
  0x1d   : > { %482 = vmatmul.mubr.msk.f32.vlgmr.msra.gmra.mxu0 %vm224_vm0, %v195_v7  ;;  %485 = vmatmul.mubr.msk.f32.vlgmr.msra.gmra.mxu1 %vm224_vm0, %v197_v8  ;;  %p570_p0 = pneg %p569_p13 }
  0x1e   : > { %221 = vperm.xlu1 %550, %v203_v9   ;;  %211 = vperm.xlu0 %549, %v201_v10  }
  0x1f   : > { %p577_p5 = pnand %p576_p3, %p570_p0 }
  0x92   : > { %v217_v11 = vpop.permute.xlu1 %216  ;;  %v207_v12 = vpop.permute.xlu0 %206 }
  0x99   : > { %v222_v13 = vpop.permute.xlu1 %221  ;;  %v212_v14 = vpop.permute.xlu0 %211 }
  0xdd   : > { %v483_v15 = vpop.f32.mrf.mxu0  ;;  %v486_v16 = vpop.f32.mrf.mxu1 }
  0xde   : > { %v309_v17 = vadd.f32 %v483_v15, %v212_v14  ;;  %v319_v18 = vadd.f32 %v486_v16, %v222_v13 }
  0xdf   : > { %v303_v19 = vpop.f32.mrf.mxu0  ;;  %v313_v20 = vpop.f32.mrf.mxu1 }
  0xe0   : > { %v461_v21 = vmul.f32 -1.442695, %v309_v17  ;;  %v463_v22 = vmul.f32 -1.442695, %v319_v18  ;;  %v304_v23 = vadd.f32 %v303_v19, %v207_v12  ;;  %v314_v24 = vadd.f32 %v313_v20, %v217_v11 }
  0xe2   : > { %551 = vpow2.f32 %v461_v21  ;;  %v460_v25 = vmul.f32 -1.442695, %v304_v23  ;;  %v462_v26 = vmul.f32 -1.442695, %v314_v24 }
  0xe3   : > { %553 = vpow2.f32 %v463_v22 }
  0xe4   : > { %555 = vpow2.f32 %v460_v25 }
  0xe5   : > { %557 = vpow2.f32 %v462_v26 }
  0xef   : > { %v552_v27 = vpop.eup %551 }
  0xf0   : > { %v554_v28 = vpop.eup %553  ;;  %v335_v29 = vadd.f32 1.0, %v552_v27 }
  0xf1   : > { %v556_v30 = vpop.eup %555  ;;  %v337_v31 = vadd.f32 1.0, %v554_v28 }
  0xf2   : > { %v558_v32 = vpop.eup %557  ;;  %559 = vrcp.f32 %v335_v29  ;;  %v334_v33 = vadd.f32 1.0, %v556_v30 }
  0xf3   : > { %561 = vrcp.f32 %v337_v31  ;;  %v336_v34 = vadd.f32 1.0, %v558_v32 }
  0xf4   : > { %563 = vrcp.f32 %v334_v33 }
  0xf5   : > { %565 = vrcp.f32 %v336_v34 }
  0xff   : > { %v560_v35 = vpop.eup %559 }
 0x100   : > { %v562_v36 = vpop.eup %561  ;;  %v347_v37 = vmul.f32 %v560_v35, %v309_v17 }
 0x101   : > { %v564_v38 = vpop.eup %563  ;;  %v349_v39 = vmul.f32 %v562_v36, %v319_v18 }
 0x102   : > { %v566_v40 = vpop.eup %565  ;;  %352 = vst.msk [vmem:[%s185_s5 + $0x8] sm:$0xff] %vm350_vm1, %v347_v37  ;;  %v346_v41 = vmul.f32 %v564_v38, %v304_v23 }
 0x103   : > { %354 = vst.msk [vmem:[%s185_s5 + $0x18] sm:$0xff] %vm350_vm1, %v349_v39  ;;  %v348_v42 = vmul.f32 %v566_v40, %v314_v24 }
 0x104   : > { %351 = vst.msk [vmem:[%s185_s5] sm:$0xff] %vm350_vm1, %v346_v41 }
 0x105   : > { %353 = vst.msk [vmem:[%s185_s5 + $0x10] sm:$0xff] %vm350_vm1, %v348_v42 }
 0x106   : > { %580 = shalt.err (!%p577_p5)
}
 0x107   : > { %s581_s23 = scalar_lea.hbm %s763_s10, 512  ;;  %s585_s28 = scalar_lea.hbm %s818_s3, 1024 }
 0x108   : > { %p582_p6 = scmp.ne.s32.totalorder %s763_s10, %s581_s23  ;;  %p586_p10 = scmp.lt.s32.totalorder %s763_s10, %s818_s3 }
 0x109   : > { %p587_p11 = scmp.lt.s32.totalorder %s585_s28, %s581_s23 }
 0x10a   : > { %p583_p7 = pnand %p582_p6, %p709_p4 }
 0x10b   : > { %p588_p12 = por %p587_p11, %p586_p10 }
 0x10c   : > { %p584_p9 = pneg %p583_p7 }
 0x10e   : > { %p589_p13 = pnand %p588_p12, %p584_p9 }
 0x110   : > { %592 = shalt.err (!%p589_p13)
}
 0x111   : > { %s647_s4 = smov 128   ;;  %s648_s5 = smov 8  }
 0x112   : > { %491 = dma.vmem_to_hbm [thread:$0]  (%p709_p4), %s765_s6, 512, %s763_s10, %s770_s15, %s647_s4, %s647_s4, %s648_s5  }
 0x113 PF: > { %p497_p0 = scmp.ge.s32.totalorder %s643_s17, 2  ;;  %s385_s7 = sand.u32 1, %s623_s12  }
 0x114   : > { %s386_s8 = scalar_lea.sflag [#allocation3], %s385_s7 }
 0x115   : > { %p494_p1 = pnand %p497_p0, %p716_p8 }
 0x117   : > { %p495_p2 = pneg %p494_p1 }
 0x119   : > { %618 = dma.done.wait (%p495_p2), %s386_s8, 512  }
 0x11a   : > { %620 = vsyncadd (%p495_p2), %s386_s8, 4294966784  ;;  %s16_s17 = sadd.s32 1, %s643_s17   ;;  %s821_s12 = smov %s627_s13 }
 0x11b   : > { %p13_p3 = scmp.ge.s32.totalorder %s16_s17, 4   ;;  %s822_s13 = smov %s631_s14 }
 0x11c   : > { %s823_s14 = smov %s722_s25  ;;  %s824_s15 = smov %s639_s16 }
 0x11d   : > { %s825_s16 = smov %s827_s20  ;;  %15 = sbr.rel (!%p13_p3) target bundleno = 4 (0x4), region = 67 }
 0x122   :  { %391 = vsyncpa [#allocation3], 1 }
 0x123   :  { %393 = vsyncpa [#allocation3 + $0x1], 1 }

</bundles_post_ra>
